<compile_context>
chip_gen: v5e
topology: v5e:2x2
jax: 0.10.0
libtpu: 0.0.40
codegen_flags: <defaults>
</compile_context>

<pallas_src>
import jax
import jax.numpy as jnp
from jax import lax
from jax.experimental import pallas as pl
from jax.experimental.pallas import tpu as pltpu


def rnn_kernel(tok_ref, emb_hbm, w_ih_t_ref, w_hh_t_ref, bias_ref,
               w_fc_t_ref, b_fc_ref, out_ref, x_buf, hid_ref, sem):
    """tanh-RNN over the T-1 pseudo-batch column + FC + softmax.

    tok_ref:    (B,)     SMEM  last-token id per sequence (one per step)
    emb_hbm:    (V, E)   HBM   embedding table (rows gathered via DMA)
    w_ih_t_ref: (E, Hp)  VMEM  W_ih^T, zero-padded to Hp lanes  (compute dtype)
    w_hh_t_ref: (Hp, Hp) VMEM  W_hh^T, zero-padded              (compute dtype)
    bias_ref:   (1, Hp)  VMEM  b_ih + b_hh, zero-padded         (f32)
    w_fc_t_ref: (Hp, Op) VMEM  W_fc^T, zero-padded              (compute dtype)
    b_fc_ref:   (1, Op)  VMEM  b_fc, padded lanes pinned to -1e30 (f32)
    out_ref:    (B, Op)  VMEM  softmax probabilities (padded lanes = 0)
    x_buf:      (B, E)   VMEM scratch  gathered embedding rows
    hid_ref:    (B, Hp)  VMEM scratch  pre-activations, then hidden states
    sem:        (B,)     DMA semaphores
    """
    B = x_buf.shape[0]
    cdt = w_hh_t_ref.dtype

    # ---- Fused embedding gather: one row DMA per recurrence step.  All copies
    # are issued back-to-back, then waited; none of this touches the serial
    # recurrence chain.
    for b in range(B):                                   # static, tiny B
        pltpu.make_async_copy(emb_hbm.at[pl.ds(tok_ref[b], 1), :],
                              x_buf.at[pl.ds(b, 1), :],
                              sem.at[b]).start()
    for b in range(B):
        pltpu.make_async_copy(emb_hbm.at[pl.ds(tok_ref[b], 1), :],
                              x_buf.at[pl.ds(b, 1), :],
                              sem.at[b]).wait()

    # ---- Hoisted input projection: all B steps in a single MXU call, f32 acc.
    pre_in = (jnp.dot(x_buf[...].astype(cdt), w_ih_t_ref[...],
                      preferred_element_type=jnp.float32)
              + bias_ref[...])                           # (B, Hp) f32
    hid_ref[...] = pre_in    # row t holds pre_in[t] until step t overwrites it

    # ---- Serial recurrence.  The hidden row is a register-carried fori_loop
    # value; hid_ref[t] is written once per step for the later FC read and is
    # never re-read on the dependency chain.  h_0 = 0, so step 0 needs no W_hh
    # matmul at all.
    # TODO(synk): hold W_hh in MXU weight registers across steps
    # (pltpu.matmul_push_rhs / matmul_acc_lhs / matmul_pop) to drop the
    # per-step RHS push from the serial path.
    h0 = jnp.tanh(pre_in[0:1, :])
    hid_ref[0:1, :] = h0

    def step(t, h_prev):
        pre_t = hid_ref[pl.ds(t, 1), :]                  # == pre_in[t]
        h = jnp.tanh(pre_t + jnp.dot(h_prev.astype(cdt), w_hh_t_ref[...],
                                     preferred_element_type=jnp.float32))
        hid_ref[pl.ds(t, 1), :] = h                      # for the FC read only
        return h

    lax.fori_loop(1, B, step, h0, unroll=True)

    # ---- Lane-dense FC + softmax(dim=1).  Padded lanes carry a -1e30 bias, so
    # exp() underflows to exactly 0 and the softmax denominator is unaffected.
    logits = (jnp.dot(hid_ref[...].astype(cdt), w_fc_t_ref[...],
                      preferred_element_type=jnp.float32)
              + b_fc_ref[...])                           # (B, Op) f32
    m = jnp.max(logits, axis=1, keepdims=True)
    e = jnp.exp(logits - m)
    inv = pl.reciprocal(jnp.sum(e, axis=1, keepdims=True), approx=True)
    out_ref[...] = e * inv


def _round_up(x, m):
    return (x + m - 1) // m * m


def rnn_forward(tokens, emb_table, w_ih, w_hh, b_ih, b_hh, w_fc, b_fc,
                compute_dtype=jnp.float32):
    """Pallas forward.  `compute_dtype=jnp.bfloat16` enables bf16 MXU inputs
    (accumulation stays f32); keep f32 (default) on v5e / long recurrences."""
    B = tokens.shape[0]
    E = emb_table.shape[1]
    H = w_hh.shape[0]
    O = w_fc.shape[0]
    Hp = _round_up(H, 128)
    Op = _round_up(O, 128)

    # Only pseudo-batch column T-1 of the batch_first=False recurrence is ever
    # consumed by `x[:, -1, :]`; the kernel DMA-gathers exactly those B rows.
    last_tokens = tokens[:, -1].astype(jnp.int32)                    # (B,)

    # Pre-transposed, lane-padded weights.  Zero pads keep padded hidden lanes
    # exactly 0 through tanh; the -1e30 pad on the FC bias zeroes the padded
    # softmax lanes.
    # TODO(synk): store weights persistently in this layout so the
    # transpose/pad/cast is one-time, not per call (it is only free here if XLA
    # constant-folds it).
    w_ih_t = jnp.zeros((E, Hp), compute_dtype).at[:, :H].set(
        w_ih.T.astype(compute_dtype))
    w_hh_t = jnp.zeros((Hp, Hp), compute_dtype).at[:H, :H].set(
        w_hh.T.astype(compute_dtype))
    bias = jnp.zeros((1, Hp), jnp.float32).at[:, :H].set(
        (b_ih + b_hh).astype(jnp.float32)[None, :])
    w_fc_t = jnp.zeros((Hp, Op), compute_dtype).at[:H, :O].set(
        w_fc.T.astype(compute_dtype))
    b_fc_p = jnp.full((1, Op), -1e30, jnp.float32).at[:, :O].set(
        b_fc.astype(jnp.float32)[None, :])

    vmem = pl.BlockSpec(memory_space=pltpu.MemorySpace.VMEM)
    smem = pl.BlockSpec(memory_space=pltpu.MemorySpace.SMEM)
    hbm = pl.BlockSpec(memory_space=pl.ANY)

    # TODO(synk): at production B/E, add a B-chunked ("arbitrary") grid so the
    # input projection streams via BlockSpec pipelining (bounding VMEM for
    # v7x's 64 MiB), plus an outer "parallel" axis over independent batches to
    # occupy both v7x TensorCores.
    out = pl.pallas_call(
        rnn_kernel,
        out_shape=jax.ShapeDtypeStruct((B, Op), jnp.float32),
        in_specs=[smem, hbm, vmem, vmem, vmem, vmem, vmem],
        out_specs=vmem,
        scratch_shapes=[pltpu.VMEM((B, E), emb_table.dtype),
                        pltpu.VMEM((B, Hp), jnp.float32),
                        pltpu.SemaphoreType.DMA((B,))],
        compiler_params=pltpu.CompilerParams(
            vmem_limit_bytes=32 * 1024 * 1024),
    )(last_tokens, emb_table, w_ih_t, w_hh_t, bias, w_fc_t, b_fc_p)
    return out[:, :O]


def rnn_forward_ref(tokens, emb_table, w_ih, w_hh, b_ih, b_hh, w_fc, b_fc):
    """Pure-JAX reference mirroring the PyTorch forward exactly (full (T, H)
    pseudo-batch recurrence in f32, then x[:, -1, :])."""
    emb_x = jnp.take(emb_table, tokens, axis=0).astype(jnp.float32)  # (B, T, E)
    B, T, _ = emb_x.shape
    H = w_hh.shape[0]
    h = jnp.zeros((T, H), jnp.float32)
    outs = []
    for t in range(B):
        h = jnp.tanh(emb_x[t] @ w_ih.T + h @ w_hh.T + b_ih + b_hh)
        outs.append(h[T - 1])
    last_hidden = jnp.stack(outs, axis=0)                            # (B, H)
    logits = last_hidden @ w_fc.T + b_fc
    return jax.nn.softmax(logits, axis=1)


if __name__ == "__main__":
    # Small shapes consistent with the module (defaults scaled down).
    VOCAB, EMB, HID, OUT = 50, 64, 32, 4
    B, T = 2, 8     # B sequences of length T (as fed to the module)

    key = jax.random.PRNGKey(0)
    k_tok, k_emb, k_wih, k_whh, k_bih, k_bhh, k_wfc, k_bfc = jax.random.split(key, 8)

    tokens = jax.random.randint(k_tok, (B, T), 0, VOCAB, dtype=jnp.int32)

    # nn.Embedding: N(0,1), with padding_idx=0 row zeroed.
    emb_table = jax.random.normal(k_emb, (VOCAB, EMB), jnp.float32)
    emb_table = emb_table.at[0].set(0.0)

    # nn.RNN / nn.Linear: uniform(-1/sqrt(fan), 1/sqrt(fan)).
    s_rnn = 1.0 / jnp.sqrt(jnp.float32(HID))
    w_ih = jax.random.uniform(k_wih, (HID, EMB), jnp.float32, -s_rnn, s_rnn)
    w_hh = jax.random.uniform(k_whh, (HID, HID), jnp.float32, -s_rnn, s_rnn)
    b_ih = jax.random.uniform(k_bih, (HID,), jnp.float32, -s_rnn, s_rnn)
    b_hh = jax.random.uniform(k_bhh, (HID,), jnp.float32, -s_rnn, s_rnn)

    s_fc = 1.0 / jnp.sqrt(jnp.float32(HID))
    w_fc = jax.random.uniform(k_wfc, (OUT, HID), jnp.float32, -s_fc, s_fc)
    b_fc = jax.random.uniform(k_bfc, (OUT,), jnp.float32, -s_fc, s_fc)

    ref = rnn_forward_ref(tokens, emb_table, w_ih, w_hh, b_ih, b_hh, w_fc, b_fc)

    # f32 compute path: faithful to the PyTorch module's float32 math
    # (pl.reciprocal(approx=True) leaves ~1e-3-level normalization error).
    out_f32 = jax.block_until_ready(
        rnn_forward(tokens, emb_table, w_ih, w_hh, b_ih, b_hh, w_fc, b_fc,
                    compute_dtype=jnp.float32))
    assert out_f32.shape == (B, OUT)
    assert jnp.allclose(out_f32, ref, rtol=2e-3, atol=2e-3), (out_f32, ref)

    # bf16 MXU path (production option): bf16 matmul inputs, f32 accumulation.
    out_bf16 = jax.block_until_ready(
        rnn_forward(tokens, emb_table, w_ih, w_hh, b_ih, b_hh, w_fc, b_fc,
                    compute_dtype=jnp.bfloat16))
    assert out_bf16.shape == (B, OUT)
    assert jnp.allclose(out_bf16, ref, rtol=2e-2, atol=2e-2), (out_bf16, ref)

    print("KERNEL_OK")
</pallas_src>

<mosaic_0001>
module attributes {stable_mosaic.version = 11 : i64} {
  func.func @rnn_kernel(%arg0: memref<2xi32, #tpu.memory_space<smem>>, %arg1: memref<50x64xf32, #tpu.memory_space<any>>, %arg2: memref<64x128xf32, #tpu.memory_space<vmem>>, %arg3: memref<128x128xf32, #tpu.memory_space<vmem>>, %arg4: memref<1x128xf32, #tpu.memory_space<vmem>>, %arg5: memref<128x128xf32, #tpu.memory_space<vmem>>, %arg6: memref<1x128xf32, #tpu.memory_space<vmem>>, %arg7: memref<2x128xf32, #tpu.memory_space<vmem>>, %arg8: memref<2x64xf32, #tpu.memory_space<vmem>>, %arg9: memref<2x128xf32, #tpu.memory_space<vmem>>, %arg10: memref<2x!tpu.dma_semaphore, #tpu.memory_space<semaphore_mem>>) attributes {dimension_semantics = [], scalar_prefetch = 0 : i64, scratch_operands = 3 : i64, tpu.core_type = #tpu.core_type<tc>} {
    %c0 = arith.constant 0 : index
    %0 = memref.load %arg0[%c0] : memref<2xi32, #tpu.memory_space<smem>>
    %c0_i32 = arith.constant 0 : i32
    %c0_i32_0 = arith.constant 0 : i32
    %1 = tpu.memref_slice %arg1[%0, %c0_i32_0] : memref<50x64xf32, #tpu.memory_space<any>> -> memref<1x64xf32, #tpu.memory_space<any>>
    %c0_i32_1 = arith.constant 0 : i32
    %c0_i32_2 = arith.constant 0 : i32
    %2 = tpu.memref_slice %arg8[%c0_i32_1, %c0_i32_2] : memref<2x64xf32, #tpu.memory_space<vmem>> -> memref<1x64xf32, #tpu.memory_space<vmem>>
    %3 = tpu.memref_slice %arg10[%c0_i32] : memref<2x!tpu.dma_semaphore, #tpu.memory_space<semaphore_mem>> -> memref<1x!tpu.dma_semaphore, #tpu.memory_space<semaphore_mem>>
    %4 = tpu.memref_squeeze %3 : memref<1x!tpu.dma_semaphore, #tpu.memory_space<semaphore_mem>> -> memref<!tpu.dma_semaphore, #tpu.memory_space<semaphore_mem>>
    tpu.enqueue_dma source(%1 : memref<1x64xf32, #tpu.memory_space<any>>) target(%2 : memref<1x64xf32, #tpu.memory_space<vmem>>) target_semaphore(%4 : memref<!tpu.dma_semaphore, #tpu.memory_space<semaphore_mem>>)
    %c1 = arith.constant 1 : index
    %5 = memref.load %arg0[%c1] : memref<2xi32, #tpu.memory_space<smem>>
    %c1_i32 = arith.constant 1 : i32
    %c0_i32_3 = arith.constant 0 : i32
    %6 = tpu.memref_slice %arg1[%5, %c0_i32_3] : memref<50x64xf32, #tpu.memory_space<any>> -> memref<1x64xf32, #tpu.memory_space<any>>
    %c1_i32_4 = arith.constant 1 : i32
    %c0_i32_5 = arith.constant 0 : i32
    %7 = tpu.memref_slice %arg8[%c1_i32_4, %c0_i32_5] : memref<2x64xf32, #tpu.memory_space<vmem>> -> memref<1x64xf32, #tpu.memory_space<vmem>>
    %8 = tpu.memref_slice %arg10[%c1_i32] : memref<2x!tpu.dma_semaphore, #tpu.memory_space<semaphore_mem>> -> memref<1x!tpu.dma_semaphore, #tpu.memory_space<semaphore_mem>>
    %9 = tpu.memref_squeeze %8 : memref<1x!tpu.dma_semaphore, #tpu.memory_space<semaphore_mem>> -> memref<!tpu.dma_semaphore, #tpu.memory_space<semaphore_mem>>
    tpu.enqueue_dma source(%6 : memref<1x64xf32, #tpu.memory_space<any>>) target(%7 : memref<1x64xf32, #tpu.memory_space<vmem>>) target_semaphore(%9 : memref<!tpu.dma_semaphore, #tpu.memory_space<semaphore_mem>>)
    %c0_6 = arith.constant 0 : index
    %10 = memref.load %arg0[%c0_6] : memref<2xi32, #tpu.memory_space<smem>>
    %c0_i32_7 = arith.constant 0 : i32
    %c0_i32_8 = arith.constant 0 : i32
    %11 = tpu.memref_slice %arg1[%10, %c0_i32_8] : memref<50x64xf32, #tpu.memory_space<any>> -> memref<1x64xf32, #tpu.memory_space<any>>
    %c0_i32_9 = arith.constant 0 : i32
    %c0_i32_10 = arith.constant 0 : i32
    %12 = tpu.memref_slice %arg8[%c0_i32_9, %c0_i32_10] : memref<2x64xf32, #tpu.memory_space<vmem>> -> memref<1x64xf32, #tpu.memory_space<vmem>>
    %13 = tpu.memref_slice %arg10[%c0_i32_7] : memref<2x!tpu.dma_semaphore, #tpu.memory_space<semaphore_mem>> -> memref<1x!tpu.dma_semaphore, #tpu.memory_space<semaphore_mem>>
    %14 = tpu.memref_squeeze %13 : memref<1x!tpu.dma_semaphore, #tpu.memory_space<semaphore_mem>> -> memref<!tpu.dma_semaphore, #tpu.memory_space<semaphore_mem>>
    tpu.wait_dma2 semaphore(%14 : memref<!tpu.dma_semaphore, #tpu.memory_space<semaphore_mem>>) src(%11 : memref<1x64xf32, #tpu.memory_space<any>>) dst(%12 : memref<1x64xf32, #tpu.memory_space<vmem>>)
    %c1_11 = arith.constant 1 : index
    %15 = memref.load %arg0[%c1_11] : memref<2xi32, #tpu.memory_space<smem>>
    %c1_i32_12 = arith.constant 1 : i32
    %c0_i32_13 = arith.constant 0 : i32
    %16 = tpu.memref_slice %arg1[%15, %c0_i32_13] : memref<50x64xf32, #tpu.memory_space<any>> -> memref<1x64xf32, #tpu.memory_space<any>>
    %c1_i32_14 = arith.constant 1 : i32
    %c0_i32_15 = arith.constant 0 : i32
    %17 = tpu.memref_slice %arg8[%c1_i32_14, %c0_i32_15] : memref<2x64xf32, #tpu.memory_space<vmem>> -> memref<1x64xf32, #tpu.memory_space<vmem>>
    %18 = tpu.memref_slice %arg10[%c1_i32_12] : memref<2x!tpu.dma_semaphore, #tpu.memory_space<semaphore_mem>> -> memref<1x!tpu.dma_semaphore, #tpu.memory_space<semaphore_mem>>
    %19 = tpu.memref_squeeze %18 : memref<1x!tpu.dma_semaphore, #tpu.memory_space<semaphore_mem>> -> memref<!tpu.dma_semaphore, #tpu.memory_space<semaphore_mem>>
    tpu.wait_dma2 semaphore(%19 : memref<!tpu.dma_semaphore, #tpu.memory_space<semaphore_mem>>) src(%16 : memref<1x64xf32, #tpu.memory_space<any>>) dst(%17 : memref<1x64xf32, #tpu.memory_space<vmem>>)
    %c0_16 = arith.constant 0 : index
    %c0_17 = arith.constant 0 : index
    %20 = vector.load %arg8[%c0_16, %c0_17] : memref<2x64xf32, #tpu.memory_space<vmem>>, vector<2x64xf32>
    %c0_18 = arith.constant 0 : index
    %c0_19 = arith.constant 0 : index
    %21 = vector.load %arg2[%c0_18, %c0_19] : memref<64x128xf32, #tpu.memory_space<vmem>>, vector<64x128xf32>
    %cst = arith.constant dense<0.000000e+00> : vector<2x128xf32>
    %22 = tpu.matmul %20, %21, %cst {dimension_numbers = #tpu.dot_dimension_numbers<[1], [0], [0], [1], [0, 0, 1, 1], [], []>} : vector<2x64xf32>, vector<64x128xf32>, vector<2x128xf32> -> vector<2x128xf32>
    %c0_20 = arith.constant 0 : index
    %c0_21 = arith.constant 0 : index
    %23 = vector.load %arg4[%c0_20, %c0_21] : memref<1x128xf32, #tpu.memory_space<vmem>>, vector<1x128xf32>
    %24 = vector.broadcast %23 : vector<1x128xf32> to vector<2x128xf32>
    %25 = arith.addf %22, %24 : vector<2x128xf32>
    %c0_22 = arith.constant 0 : index
    %c0_23 = arith.constant 0 : index
    %26 = vector.load %arg9[%c0_22, %c0_23] : memref<2x128xf32, #tpu.memory_space<vmem>>, vector<2x128xf32>
    tpu.vector_store %arg9[%c0_22, %c0_23], %25 {strides = array<i32>} : memref<2x128xf32, #tpu.memory_space<vmem>>, vector<2x128xf32>,
    %27 = vector.extract_strided_slice %25 {offsets = [0, 0], sizes = [1, 128], strides = [1, 1]} : vector<2x128xf32> to vector<1x128xf32>
    %28 = math.tanh %27 : vector<1x128xf32>
    %c0_24 = arith.constant 0 : index
    %c0_25 = arith.constant 0 : index
    %29 = vector.load %arg9[%c0_24, %c0_25] : memref<2x128xf32, #tpu.memory_space<vmem>>, vector<1x128xf32>
    tpu.vector_store %arg9[%c0_24, %c0_25], %28 {strides = array<i32>} : memref<2x128xf32, #tpu.memory_space<vmem>>, vector<1x128xf32>,
    %c1_i32_26 = arith.constant 1 : i32
    %30 = arith.index_cast %c1_i32_26 : i32 to index
    %c0_27 = arith.constant 0 : index
    %31 = vector.load %arg9[%30, %c0_27] : memref<2x128xf32, #tpu.memory_space<vmem>>, vector<1x128xf32>
    %c0_28 = arith.constant 0 : index
    %c0_29 = arith.constant 0 : index
    %32 = vector.load %arg3[%c0_28, %c0_29] : memref<128x128xf32, #tpu.memory_space<vmem>>, vector<128x128xf32>
    %cst_30 = arith.constant dense<0.000000e+00> : vector<1x128xf32>
    %33 = tpu.matmul %28, %32, %cst_30 {dimension_numbers = #tpu.dot_dimension_numbers<[1], [0], [0], [1], [0, 0, 1, 1], [], []>} : vector<1x128xf32>, vector<128x128xf32>, vector<1x128xf32> -> vector<1x128xf32>
    %34 = arith.addf %31, %33 : vector<1x128xf32>
    %35 = math.tanh %34 : vector<1x128xf32>
    %36 = arith.index_cast %c1_i32_26 : i32 to index
    %c0_31 = arith.constant 0 : index
    %37 = vector.load %arg9[%36, %c0_31] : memref<2x128xf32, #tpu.memory_space<vmem>>, vector<1x128xf32>
    tpu.vector_store %arg9[%36, %c0_31], %35 {strides = array<i32>} : memref<2x128xf32, #tpu.memory_space<vmem>>, vector<1x128xf32>,
    %c1_i32_32 = arith.constant 1 : i32
    %c0_33 = arith.constant 0 : index
    %c0_34 = arith.constant 0 : index
    %38 = vector.load %arg9[%c0_33, %c0_34] : memref<2x128xf32, #tpu.memory_space<vmem>>, vector<2x128xf32>
    %c0_35 = arith.constant 0 : index
    %c0_36 = arith.constant 0 : index
    %39 = vector.load %arg5[%c0_35, %c0_36] : memref<128x128xf32, #tpu.memory_space<vmem>>, vector<128x128xf32>
    %cst_37 = arith.constant dense<0.000000e+00> : vector<2x128xf32>
    %40 = tpu.matmul %38, %39, %cst_37 {dimension_numbers = #tpu.dot_dimension_numbers<[1], [0], [0], [1], [0, 0, 1, 1], [], []>} : vector<2x128xf32>, vector<128x128xf32>, vector<2x128xf32> -> vector<2x128xf32>
    %c0_38 = arith.constant 0 : index
    %c0_39 = arith.constant 0 : index
    %41 = vector.load %arg6[%c0_38, %c0_39] : memref<1x128xf32, #tpu.memory_space<vmem>>, vector<1x128xf32>
    %42 = vector.broadcast %41 : vector<1x128xf32> to vector<2x128xf32>
    %43 = arith.addf %40, %42 : vector<2x128xf32>
    %cst_40 = arith.constant dense<0xFF800000> : vector<2xf32>
    %44 = vector.multi_reduction <maximumf>, %43, %cst_40 [1] : vector<2x128xf32> to vector<2xf32>
    %45 = vector.shape_cast %44 : vector<2xf32> to vector<2x1xf32>
    %46 = vector.broadcast %45 : vector<2x1xf32> to vector<2x128xf32>
    %47 = arith.subf %43, %46 : vector<2x128xf32>
    %48 = math.exp %47 : vector<2x128xf32>
    %cst_41 = arith.constant dense<0.000000e+00> : vector<2xf32>
    %49 = vector.multi_reduction <add>, %48, %cst_41 [1] : vector<2x128xf32> to vector<2xf32>
    %50 = vector.shape_cast %49 : vector<2xf32> to vector<2x1xf32>
    %51 = tpu.reciprocal %50 {approx = true} : vector<2x1xf32> -> vector<2x1xf32>
    %52 = vector.broadcast %51 : vector<2x1xf32> to vector<2x128xf32>
    %53 = arith.mulf %48, %52 : vector<2x128xf32>
    %c0_42 = arith.constant 0 : index
    %c0_43 = arith.constant 0 : index
    %54 = vector.load %arg7[%c0_42, %c0_43] : memref<2x128xf32, #tpu.memory_space<vmem>>, vector<2x128xf32>
    tpu.vector_store %arg7[%c0_42, %c0_43], %53 {strides = array<i32>} : memref<2x128xf32, #tpu.memory_space<vmem>>, vector<2x128xf32>,
    return
  }
}

</mosaic_0001>

<bundles_post_ra>
// kernel: tpu_custom_call.1
= control target key start
LH: loop header
LB: loop body
LE: loop exit
PB: predicated region body
PF: predicated region fallthrough
CT: control target
= control target key end

     0   :  { %12 = vsyncpa [#allocation8], 0  ;;  %s571_s0 = inlined_call_operand.hbm [shape: s32[2], index: 0, kind: input, shape index: {}]   ;;  %s572_s1 = inlined_call_operand.hbm [shape: f32[50,64], index: 1, kind: input, shape index: {}]   ;;  %s573_s2 = inlined_call_operand.hbm [shape: f32[64,128], index: 2, kind: input, shape index: {}]   ;;  %s574_s3 = inlined_call_operand.hbm [shape: f32[128,128], index: 3, kind: input, shape index: {}]   ;;  %s575_s4 = inlined_call_operand.vmem [shape: f32[1,128], index: 4, kind: input, shape index: {}]   ;;  %s576_s5 = inlined_call_operand.hbm [shape: f32[128,128], index: 5, kind: input, shape index: {}]   ;;  %s577_s6 = inlined_call_operand.vmem [shape: f32[1,128], index: 6, kind: input, shape index: {}]   ;;  %s578_s7 = inlined_call_operand.hbm [shape: f32[2,128], index: 7, kind: output, shape index: {}]  }
   0x1   :  { %13 = vsyncpa [#allocation6], 0 }
   0x2   :  { %14 = vsyncpa [#allocation11], 0 }
   0x3   :  { %15 = vsyncpa [#allocation7], 0  ;;  %s42_s26 = sshll.u32 %s574_s3, 4  ;;  %s483_s27 = smov [#allocation10]   ;;  %s43_s26 = int_to_ptr.hbm [resolvable:$true] %s42_s26 }
   0x4   :  { %s44_s28 = sshll.u32 %s483_s27, 4  ;;  %s21_s8 = sshll.u32 %s571_s0, 4  ;;  %s45_s28 = int_to_ptr.vmem [resolvable:$true] %s44_s28  ;;  %s22_s8 = int_to_ptr.hbm [resolvable:$true] %s21_s8 }
   0x5   :  { %s484_s9 = smov 128   ;;  %s485_s10 = smov 8  }
   0x6   :  { %50 = dma.hbm_to_vmem [thread:$0]  %s43_s26, 2048, %s45_s28, [#allocation11], %s484_s9, %s484_s9, %s485_s10  }
   0x7   :  { %s486_s11 = smov [#allocation5]   ;;  %s29_s14 = sshll.u32 %s573_s2, 4  ;;  %s30_s14 = int_to_ptr.hbm [resolvable:$true] %s29_s14 }
   0x8   :  { %24 = dma.hbm_to_smem %s22_s8, 16, %s486_s11, [#allocation8]  }
   0x9   :  { %s487_s3 = smov [#allocation9]   ;;  %s57_s18 = sshll.u32 %s576_s5, 4  ;;  %s58_s18 = int_to_ptr.hbm [resolvable:$true] %s57_s18 }
   0xa   :  { %s31_s15 = sshll.u32 %s487_s3, 4  ;;  %s488_s0 = smov [#allocation12]   ;;  %s32_s15 = int_to_ptr.vmem [resolvable:$true] %s31_s15 }
   0xb   :  { %37 = dma.hbm_to_vmem [thread:$0]  %s30_s14, 1024, %s32_s15, [#allocation6], %s484_s9, %s484_s9, %s485_s10  }
   0xc   :  { %s59_s19 = sshll.u32 %s488_s0, 4  ;;  %s60_s19 = int_to_ptr.vmem [resolvable:$true] %s59_s19 }
   0xd   :  { %65 = dma.hbm_to_vmem [thread:$0]  %s58_s18, 2048, %s60_s19, [#allocation11], %s484_s9, %s484_s9, %s485_s10  }
   0xe   :  { %471 = dma.done.wait [#allocation8], 16  }
   0xf   :  { %472 = vsyncadd [#allocation8], 4294967280 }
  0x10   :  { %473 = dma.done.wait [#allocation6], 1024  }
  0x11   :  { %474 = vsyncadd [#allocation6], 4294966272 }
  0x12   :  { %475 = dma.done.wait [#allocation11], 4096  }
  0x13   :  { %476 = vsyncadd [#allocation11], 4294963200 }
  0x14   :  { %84 = sfence }
  0x15   :  { %s85_s2 = sld [smem:[#allocation5]]  ;;  %s489_s21 = smov [#allocation2]  }
  0x16   :  { %s292_s20 = sld [smem:[#allocation5 + $0x1]]  ;;  %s96_s22 = sshll.u32 %s489_s21, 4  ;;  %s97_s22 = int_to_ptr.vmem [resolvable:$true] %s96_s22 }
  0x17   :  { %s490_s23 = smov [#allocation2 + $0x1]   ;;  %s403_s13 = scalar_lea.hbm %s572_s1, 56 }
  0x18   :  { %s544_s24 = sshll.u32 %s490_s23, 4  ;;  %s114_s24 = int_to_ptr.vmem [resolvable:$true] %s544_s24 }
  0x1b   :  { %s86_s26 = scalar_lea.hbm %s572_s1, %s85_s2 }
  0x1c   :  { %s94_s27 = sshll.u32 %s86_s26, 4  ;;  %s101_s30 = scalar_lea.hbm %s572_s1, %s292_s20  ;;  %s95_s27 = int_to_ptr.hbm [resolvable:$true] %s94_s27 }
  0x1d   :  { %s111_s8 = sshll.u32 %s101_s30, 4  ;;  %s399_s9 = sshra.s32 %s95_s27, 4  ;;  %s400_s9 = int_to_ptr.hbm [resolvable:$true] %s399_s9  ;;  %s112_s8 = int_to_ptr.hbm [resolvable:$true] %s111_s8 }
  0x1e   :  { %s401_s10 = scalar_lea.hbm %s400_s9, 1  ;;  %p404_p1 = scmp.lt.s32.totalorder %s400_s9, %s572_s1 }
  0x1f   :  { %p402_p0 = scmp.ne.s32.totalorder %s400_s9, %s401_s10  ;;  %p405_p2 = scmp.lt.s32.totalorder %s403_s13, %s401_s10 }
  0x21   :  { %p406_p3 = por %p405_p2, %p404_p1 }
  0x23   :  { %p407_p4 = pnand %p406_p3, %p402_p0 }
  0x25   :  { %410 = shalt.err (!%p407_p4)  }
  0x26   :  { %99 = dma.hbm_to_vmem [thread:$0]  %s95_s27, 16, %s97_s22, [#allocation4] }
  0x27   :  { %s423_s15 = sshra.s32 %s112_s8, 4  ;;  %s424_s15 = int_to_ptr.hbm [resolvable:$true] %s423_s15 }
  0x28   :  { %s425_s16 = scalar_lea.hbm %s424_s15, 1  ;;  %p428_p6 = scmp.lt.s32.totalorder %s424_s15, %s572_s1 }
  0x29   :  { %p426_p5 = scmp.ne.s32.totalorder %s424_s15, %s425_s16  ;;  %p429_p7 = scmp.lt.s32.totalorder %s403_s13, %s425_s16 }
  0x2b   :  { %p430_p8 = por %p429_p7, %p428_p6 }
  0x2d   :  { %p431_p9 = pnand %p430_p8, %p426_p5 }
  0x2f   :  { %434 = shalt.err (!%p431_p9)  }
  0x30   :  { %116 = dma.hbm_to_vmem [thread:$0]  %s112_s8, 16, %s114_s24, [#allocation4 + $0x1] }
  0x31   :  { %477 = dma.done.wait [#allocation4], 16 }
  0x32   :  { %478 = vsyncadd [#allocation4], 4294967280 }
  0x33   :  { %479 = dma.done.wait [#allocation4 + $0x1], 16 }
  0x34   :  { %480 = vsyncadd [#allocation4 + $0x1], 4294967280  ;;  %v132_v0 = vld [vmem:[#allocation9 + $0x38] sm:$0xff]  ;;  %v131_v1 = vld [vmem:[#allocation9 + $0x30] sm:$0xff]  ;;  %vm137_vm0 = vcmask 523264   ;;  %vm245_vm1 = vcmask 1041408  }
  0x35   :  { %149 = vmatpush.msra.mxu0 %v132_v0  ;;  %v130_v2 = vld [vmem:[#allocation9 + $0x28] sm:$0xff]  ;;  %v180_v3 = vld [vmem:[#allocation10 + $0x78] sm:$0xff]  ;;  %v179_v4 = vld [vmem:[#allocation10 + $0x70] sm:$0xff]  ;;  %s491_s2 = smov [#allocation13]  }
  0x36   :  { %v129_v5 = vld [vmem:[#allocation9 + $0x20] sm:$0xff]  ;;  %181 = vmatpush.msra.mxu1 %v180_v3  ;;  %v178_v6 = vld [vmem:[#allocation10 + $0x68] sm:$0xff]  ;;  %v128_v7 = vld [vmem:[#allocation9 + $0x18] sm:$0xff]  ;;  %s263_s20 = sshll.u32 %s491_s2, 4  ;;  %s264_s20 = int_to_ptr.vmem [resolvable:$true] %s263_s20 }
  0x37   :  { %150 = vmatpush.msra.mxu0 %v131_v1  ;;  %v177_v8 = vld [vmem:[#allocation10 + $0x60] sm:$0xff]  ;;  %v127_v9 = vld [vmem:[#allocation9 + $0x10] sm:$0xff]  ;;  %v176_v10 = vld [vmem:[#allocation10 + $0x58] sm:$0xff] }
  0x38   :  { %182 = vmatpush.msra.mxu1 %v179_v4  ;;  %v126_v11 = vld [vmem:[#allocation9 + $0x8] sm:$0xff]  ;;  %v175_v12 = vld [vmem:[#allocation10 + $0x50] sm:$0xff]  ;;  %v125_v13 = vld [vmem:[#allocation9] sm:$0xff] }
  0x39   :  { %151 = vmatpush.msra.mxu0 %v130_v2  ;;  %v124_v14 = vld [vmem:[#allocation2] sm:$0x3]  ;;  %v174_v15 = vld [vmem:[#allocation10 + $0x48] sm:$0xff]  ;;  %v173_v16 = vld [vmem:[#allocation10 + $0x40] sm:$0xff] }
  0x3a   :  { %183 = vmatpush.msra.mxu1 %v178_v6  ;;  %v172_v17 = vld [vmem:[#allocation10 + $0x38] sm:$0xff]  ;;  %v171_v18 = vld [vmem:[#allocation10 + $0x30] sm:$0xff]  ;;  %v170_v19 = vld [vmem:[#allocation10 + $0x28] sm:$0xff] }
  0x3b   :  { %152 = vmatpush.msra.mxu0 %v129_v5  ;;  %v169_v20 = vld [vmem:[#allocation10 + $0x20] sm:$0xff]  ;;  %v168_v21 = vld [vmem:[#allocation10 + $0x18] sm:$0xff]  ;;  %v167_v22 = vld [vmem:[#allocation10 + $0x10] sm:$0xff] }
  0x3c   :  { %184 = vmatpush.msra.mxu1 %v177_v8  ;;  %v166_v23 = vld [vmem:[#allocation10 + $0x8] sm:$0xff]  ;;  %v165_v24 = vld [vmem:[#allocation10] sm:$0xff]  ;;  %v220_v25 = vld [vmem:[#allocation12 + $0x78] sm:$0xff] }
  0x3d   :  { %153 = vmatpush.msra.mxu0 %v128_v7  ;;  %v219_v26 = vld [vmem:[#allocation12 + $0x70] sm:$0xff]  ;;  %225 = vmatpush.msra.mxu2 %v220_v25  ;;  %v218_v27 = vld [vmem:[#allocation12 + $0x68] sm:$0xff]  ;;  %v217_v28 = vld [vmem:[#allocation12 + $0x60] sm:$0xff] }
  0x3e   :  { %185 = vmatpush.msra.mxu1 %v176_v10  ;;  %v216_v29 = vld [vmem:[#allocation12 + $0x58] sm:$0xff]  ;;  %v215_v30 = vld [vmem:[#allocation12 + $0x50] sm:$0xff]  ;;  %v214_v31 = vld [vmem:[#allocation12 + $0x48] sm:$0xff] }
  0x3f   :  { %154 = vmatpush.msra.mxu0 %v127_v9  ;;  %226 = vmatpush.msra.mxu2 %v219_v26  ;;  %v305_v32 = vld [vmem:[%s575_s4] ss:$0 sm:$0xff]  ;;  %v213_v36 = vld [vmem:[#allocation12 + $0x40] sm:$0xff]  ;;  %v211_v38 = vld [vmem:[#allocation12 + $0x30] sm:$0xff] }
  0x40   :  { %186 = vmatpush.msra.mxu1 %v175_v12  ;;  %v212_v37 = vld [vmem:[#allocation12 + $0x38] sm:$0xff]  ;;  %v210_v39 = vld [vmem:[#allocation12 + $0x28] sm:$0xff]  ;;  %v209_v40 = vld [vmem:[#allocation12 + $0x20] sm:$0xff] }
  0x41   :  { %155 = vmatpush.msra.mxu0 %v126_v11  ;;  %227 = vmatpush.msra.mxu2 %v218_v27  ;;  %v208_v41 = vld [vmem:[#allocation12 + $0x18] sm:$0xff]  ;;  %v207_v42 = vld [vmem:[#allocation12 + $0x10] sm:$0xff]  ;;  %v206_v43 = vld [vmem:[#allocation12 + $0x8] sm:$0xff] }
  0x42   :  { %187 = vmatpush.msra.mxu1 %v174_v15  ;;  %v205_v44 = vld [vmem:[#allocation12] sm:$0xff]  ;;  %v306_v50 = vld [vmem:[%s577_s6] ss:$0 sm:$0xff]  ;;  %s265_s6 = sshll.u32 %s578_s7, 4  ;;  %s266_s6 = int_to_ptr.hbm [resolvable:$true] %s265_s6 }
  0x43   :  { %156 = vmatpush.msra.mxu0 %v125_v13  ;;  %228 = vmatpush.msra.mxu2 %v217_v28 }
  0x44   :  { %293 = vmatmul.msk.f32.vlgmr.msra.gmra.mxu0 %vm137_vm0, %v124_v14  ;;  %188 = vmatpush.msra.mxu1 %v173_v16 }
  0x45   :  { %229 = vmatpush.msra.mxu2 %v216_v29 }
  0x46   :  { %189 = vmatpush.msra.mxu1 %v172_v17 }
  0x47   :  { %230 = vmatpush.msra.mxu2 %v215_v30 }
  0x48   :  { %190 = vmatpush.msra.mxu1 %v171_v18 }
  0x49   :  { %231 = vmatpush.msra.mxu2 %v214_v31 }
  0x4a   :  { %191 = vmatpush.msra.mxu1 %v170_v19 }
  0x4b   :  { %232 = vmatpush.msra.mxu2 %v213_v36 }
  0x4c   :  { %192 = vmatpush.msra.mxu1 %v169_v20 }
  0x4d   :  { %233 = vmatpush.msra.mxu2 %v212_v37 }
  0x4e   :  { %193 = vmatpush.msra.mxu1 %v168_v21 }
  0x4f   :  { %234 = vmatpush.msra.mxu2 %v211_v38 }
  0x50   :  { %194 = vmatpush.msra.mxu1 %v167_v22 }
  0x51   :  { %235 = vmatpush.msra.mxu2 %v210_v39 }
  0x52   :  { %195 = vmatpush.msra.mxu1 %v166_v23 }
  0x53   :  { %236 = vmatpush.msra.mxu2 %v209_v40 }
  0x54   :  { %196 = vmatpush.msra.mxu1 %v165_v24 }
  0x55   :  { %237 = vmatpush.msra.mxu2 %v208_v41 }
  0x57   :  { %238 = vmatpush.msra.mxu2 %v207_v42 }
  0x59   :  { %239 = vmatpush.msra.mxu2 %v206_v43 }
  0x5b   :  { %240 = vmatpush.msra.mxu2 %v205_v44 }
  0xc1   :  { %v158_v33 = vpop.f32.mrf.mxu0 }
  0xc2   :  { %v159_v34 = vadd.f32 %v305_v32, %v158_v33 }
  0xc4   :  { %161 = vst [vmem:[#allocation3] sm:$0x3] %v159_v34  ;;  %307 = vtanh.f32 %v159_v34 }
  0xca   :  { %v308_v35 = vpop.eup %307 }
  0xcb   :  { %163 = vst [vmem:[#allocation3] sm:$0x1] %v308_v35  ;;  %197 = vmatmul.f32.vlgmr.msra.gmra.mxu1 %v308_v35  ;;  %v164_v45 = vld [vmem:[#allocation3 + $0x1] sm:$0x1] }
 0x148   :  { %v198_v46 = vpop.f32.mrf.mxu1 }
 0x149   :  { %v201_v47 = vadd.f32 %v198_v46, %v164_v45 }
 0x14b   :  { %309 = vtanh.f32 %v201_v47 }
 0x151   :  { %v310_v48 = vpop.eup %309 }
 0x152   :  { %203 = vst [vmem:[#allocation3 + $0x1] sm:$0x1] %v310_v48 }
 0x159   :  { %v204_v49 = vld [vmem:[#allocation3] sm:$0x3] }
 0x15a   :  { %241 = vmatmul.f32.vlgmr.msra.gmra.mxu2 %v204_v49 }
 0x1dd   :  { %v242_v51 = vpop.f32.mrf.mxu2 }
 0x1de   :  { %v243_v52 = vadd.f32 %v306_v50, %v242_v51 }
 0x1e0   :  { %v246_v53 = vsel %vm245_vm1, %v243_v52, -inf }
 0x1e1   :  { %247 = vmax.xlane.f32.xlu0 %v246_v53 }
 0x254   :  { %v248_v54 = vpop.xlane.xlu0 %247 }
 0x255   :  { %v249_v55 = vsub.f32 %v243_v52, %v248_v54 }
 0x257   :  { %v250_v56 = vmul.f32 1.442695, %v249_v55 }
 0x259   :  { %311 = vpow2.f32 %v250_v56 }
 0x25f   :  { %v312_v57 = vpop.eup %311 }
 0x260   :  { %v252_v58 = vsel %vm245_vm1, %v312_v57, 0.0 }
 0x261   :  { %253 = vadd.xlane.f32.xlu0 %v252_v58 }
 0x2d4   :  { %v254_v59 = vpop.xlane.xlu0 %253 }
 0x2d5   :  { %313 = vrcp.f32 %v254_v59 }
 0x2db   :  { %v314_v60 = vpop.eup %313 }
 0x2dc   :  { %v256_v61 = vmul.f32 %v314_v60, %v312_v57 }
 0x2de   :  { %257 = vst [vmem:[#allocation13] sm:$0x3] %v256_v61 }
 0x2df   :  { %268 = dma.vmem_to_hbm [thread:$0]  %s264_s20, 32, %s266_s6, [#allocation7]  }
 0x2e0   :  { %481 = dma.done.wait [#allocation7], 32  }
 0x2e1   :  { %482 = vsyncadd [#allocation7], 4294967264 }
 0x2e2   :  { %273 = vsyncpa [#allocation6], 1 }
 0x2e3   :  { %274 = vsyncpa [#allocation11], 1 }
 0x2e4   :  { %275 = vsyncpa [#allocation7], 1 }
 0x2e5   :  { %276 = vsyncpa [#allocation8], 1 }
 0x2e6   :  { %277 = vsyncmov [#allocation4] }
 0x2e9   :  { %s278_s23 = vpop.sfrf %277 }
 0x2ea   :  { %p294_p10 = scmp.ne.s32.totalorder %s278_s23, 0 }
 0x2ec   :  { %282 = shalt.err (%p294_p10)  }
 0x2ed   :  { %284 = vsyncmov [#allocation4 + $0x1] }
 0x2f0   :  { %s285_s24 = vpop.sfrf %284 }
 0x2f1   :  { %p295_p11 = scmp.ne.s32.totalorder %s285_s24, 0 }
 0x2f3   :  { %289 = shalt.err (%p295_p11)  }

</bundles_post_ra>
